<compile_context>
chip_gen: v6e
topology: v6e:2x2x1
jax: 0.10.0
libtpu: 0.0.40
codegen_flags: <defaults>
</compile_context>

<pallas_src>
import jax
import jax.numpy as jnp
from jax.experimental import pallas as pl
from jax.experimental.pallas import tpu as pltpu

LN_EPS = 1e-5  # PyTorch nn.LayerNorm default


def _round_up(x, m):
    return (x + m - 1) // m * m


def _cdiv(a, b):
    return (a + b - 1) // b


def _ln_with_mu(x, mu, gamma, beta):
    """LayerNorm where the mean was already produced by the MXU (extra column).

    Two-pass variance (matches PyTorch; no E[x^2]-mu^2 cancellation risk) and a
    fused (x-mu)*(rsqrt*gamma)+beta affine.  One XLU reduce per call.
    """
    xc = x - mu
    var = jnp.mean(xc * xc, axis=-1, keepdims=True)
    inv = jax.lax.rsqrt(var + LN_EPS)
    return xc * (inv * gamma) + beta


def _critic_math(x, wf, w2a, w3a, P, fc1, fc2, fc3):
    """Shared math for the kernel body and the plain-JAX emulation reference.

    x    : [B, in_dim+act_dim] bf16  (concatenated [state | action])
    wf   : [in_dim+act_dim, fc1+fc2+1] bf16  block-diag [[w1,0,mu1],[0,wa,0]]
    w2a  : [fc1, fc2+1] bf16   (last column = row-sum(w2)/fc2)
    w3a  : [fc2, fc3+1] bf16   (last column = row-sum(w3)/fc3)
    P    : [12, Fmax] f32 packed small-vector slab
    """
    b1, g1, be1 = P[0, :fc1], P[1, :fc1], P[2, :fc1]
    b2, g2, be2 = P[3, :fc2], P[4, :fc2], P[5, :fc2]
    ba = P[6, :fc2]
    b3, g3, be3 = P[7, :fc3], P[8, :fc3], P[9, :fc3]
    wq = P[10, :fc3]                       # q-head weight, lane-dense row
    bq = P[11, 0:1]                        # q-head bias
    mb1 = P[11, 1:2]                       # mean(b1)
    mb2 = P[11, 2:3]                       # mean(b2)
    mb3 = P[11, 3:4]                       # mean(b3)

    # Fused fc1 + action_value block-diagonal matmul; extra column 2*fcN carries
    # mean_j(state @ w1)_j so LN1's mean needs no cross-lane reduce.
    front = jnp.dot(x, wf, preferred_element_type=jnp.float32)
    h1_pre = front[:, :fc1] + b1
    av = front[:, fc1:fc1 + fc2] + ba
    mu1 = front[:, fc1 + fc2:fc1 + fc2 + 1] + mb1
    h1 = jnp.maximum(_ln_with_mu(h1_pre, mu1, g1, be1), 0.0).astype(jnp.bfloat16)

    # fc2 -> LayerNorm (no ReLU before the add, matching the PyTorch code).
    mid = jnp.dot(h1, w2a, preferred_element_type=jnp.float32)
    h2_pre = mid[:, :fc2] + b2
    mu2 = mid[:, fc2:fc2 + 1] + mb2
    h2 = _ln_with_mu(h2_pre, mu2, g2, be2)

    # Combine with the action branch (f32 elementwise, then bf16 for the MXU).
    sa = jnp.maximum(h2 + av, 0.0).astype(jnp.bfloat16)

    # fc3 -> LayerNorm -> ReLU
    back = jnp.dot(sa, w3a, preferred_element_type=jnp.float32)
    h3_pre = back[:, :fc3] + b3
    mu3 = back[:, fc3:fc3 + 1] + mb3
    h3 = jnp.maximum(_ln_with_mu(h3_pre, mu3, g3, be3), 0.0)

    # q head: VPU multiply + one cross-lane reduce instead of an N=1 matmul.
    return jnp.sum(h3 * wq, axis=-1, keepdims=True) + bq


def _make_critic_kernel(fc1, fc2, fc3):
    def kernel(x_ref, wf_ref, w2_ref, w3_ref, pp_ref, out_ref):
        q = _critic_math(
            x_ref[...].astype(jnp.bfloat16),   # no-op if caller supplies bf16
            wf_ref[...], w2_ref[...], w3_ref[...], pp_ref[...],
            fc1, fc2, fc3)
        out_ref[...] = q.astype(out_ref.dtype)
    return kernel


def prepare_params(params):
    """Build the augmented bf16 weights + packed f32 slab once (reused per call)."""
    w1 = jnp.asarray(params["w1"], jnp.float32)   # [in_dim, fc1]
    w2 = jnp.asarray(params["w2"], jnp.float32)   # [fc1, fc2]
    wa = jnp.asarray(params["wa"], jnp.float32)   # [act_dim, fc2]
    w3 = jnp.asarray(params["w3"], jnp.float32)   # [fc2, fc3]
    in_dim, fc1 = w1.shape
    act_dim, fc2 = wa.shape
    fc3 = w3.shape[1]
    fmax = max(fc1, fc2, fc3)

    # Block-diagonal front weight [[w1, 0, mu1_col], [0, wa, 0]].
    mu1_col = jnp.sum(w1, axis=1, keepdims=True) / fc1
    top = jnp.concatenate(
        [w1, jnp.zeros((in_dim, fc2), jnp.float32), mu1_col], axis=1)
    bot = jnp.concatenate(
        [jnp.zeros((act_dim, fc1), jnp.float32), wa,
         jnp.zeros((act_dim, 1), jnp.float32)], axis=1)
    w_front = jnp.concatenate([top, bot], axis=0).astype(jnp.bfloat16)

    w2a = jnp.concatenate(
        [w2, jnp.sum(w2, axis=1, keepdims=True) / fc2], axis=1).astype(jnp.bfloat16)
    w3a = jnp.concatenate(
        [w3, jnp.sum(w3, axis=1, keepdims=True) / fc3], axis=1).astype(jnp.bfloat16)

    def row(v):
        v = jnp.asarray(v, jnp.float32).reshape(-1)
        return jnp.pad(v, (0, fmax - v.shape[0]))

    b1 = jnp.asarray(params["b1"], jnp.float32)
    b2 = jnp.asarray(params["b2"], jnp.float32)
    b3 = jnp.asarray(params["b3"], jnp.float32)
    scal = jnp.zeros((fmax,), jnp.float32)
    scal = scal.at[0:4].set(jnp.stack([
        jnp.asarray(params["bq"], jnp.float32).reshape(()),
        jnp.mean(b1), jnp.mean(b2), jnp.mean(b3)]))

    slab = jnp.stack([
        row(b1), row(params["g1"]), row(params["be1"]),
        row(b2), row(params["g2"]), row(params["be2"]),
        row(params["ba"]),
        row(b3), row(params["g3"]), row(params["be3"]),
        row(params["wq"]), scal,
    ])

    return {
        "w_front": w_front, "w2a": w2a, "w3a": w3a, "slab": slab,
        "in_dim": in_dim, "act_dim": act_dim,
        "fc1": fc1, "fc2": fc2, "fc3": fc3,
    }


def _choose_tm(batch, block_batch):
    """Balanced batch tiles: minimal padding, >=2 grid steps when worthwhile."""
    steps = max(_cdiv(batch, block_batch), 1)
    # v7x has 2 TensorCores: with a single grid step one TC would idle.  Only
    # split once the batch is big enough that halving it is still useful work.
    if steps < 2 and batch >= 256:
        steps = 2
    align = 16 if batch >= 16 else 8   # 16 keeps bf16 intermediates tidy
    return max(_round_up(_cdiv(batch, steps), align), align)


def critic_forward(state, action, prep, *, block_batch=2048):
    """Whole critic forward pass in one Pallas call, tiled over the batch.

    Weights (bf16, with LN-mean columns folded in) and the packed param slab
    stay VMEM-resident across grid steps; only the fused [state|action] tile and
    the q output move per step.  Callers may pass bf16 state/action to halve the
    streaming HBM traffic.
    """
    batch = state.shape[0]
    fc1, fc2, fc3 = prep["fc1"], prep["fc2"], prep["fc3"]
    k_front = prep["in_dim"] + prep["act_dim"]
    n_front = fc1 + fc2 + 1
    fmax = prep["slab"].shape[1]

    # Single streaming input pipeline: concatenated [state | action] rows.
    x = jnp.concatenate([state, action], axis=1)

    tm = _choose_tm(batch, block_batch)
    padded = _round_up(batch, tm)
    if padded != batch:
        x = jnp.pad(x, ((0, padded - batch), (0, 0)))
    grid = (padded // tm,)

    tile = lambda i: (i, 0)       # batch-tiled arrays
    resident = lambda i: (0, 0)   # weights / slab: same block every step
                                  # (constant index_map -> re-DMA already skipped)

    out = pl.pallas_call(
        _make_critic_kernel(fc1, fc2, fc3),
        out_shape=jax.ShapeDtypeStruct((padded, 1), jnp.float32),
        grid=grid,
        in_specs=[
            pl.BlockSpec((tm, k_front), tile),
            pl.BlockSpec((k_front, n_front), resident),
            pl.BlockSpec((fc1, fc2 + 1), resident),
            pl.BlockSpec((fc2, fc3 + 1), resident),
            pl.BlockSpec((12, fmax), resident),
        ],
        out_specs=pl.BlockSpec((tm, 1), tile),
        compiler_params=pltpu.CompilerParams(
            dimension_semantics=("parallel",),   # 2 TCs on v7x; no-op on v5e/v6e
            vmem_limit_bytes=32 * 1024 * 1024,
        ),
    )(x, prep["w_front"], prep["w2a"], prep["w3a"], prep["slab"])
    return out[:batch]


def emulated_forward(state, action, prep):
    """Plain-JAX run of the exact kernel math (same augmented bf16 weights)."""
    x = jnp.concatenate([state, action], axis=1).astype(jnp.bfloat16)
    return _critic_math(x, prep["w_front"], prep["w2a"], prep["w3a"], prep["slab"],
                        prep["fc1"], prep["fc2"], prep["fc3"])


def init_params(key, input_dims, n_actions, fc1_dims, fc2_dims, fc3_dims):
    """Deterministic init mirroring the PyTorch __init__ uniform bounds."""
    keys = jax.random.split(key, 10)

    def unif(k, shape, bound):
        return jax.random.uniform(k, shape, jnp.float32, -bound, bound)

    f1 = 1.0 / (fc1_dims ** 0.5)   # fc1.weight.size()[0] == fc1_dims
    f2 = 1.0 / (fc2_dims ** 0.5)
    f3 = 1.0 / (fc3_dims ** 0.5)
    f4 = 0.003
    f5 = 1.0 / (fc2_dims ** 0.5)   # action_value.weight.size()[0] == fc2_dims

    return {
        # fc1: in=input_dims, out=fc1_dims (stored [in, out])
        "w1": unif(keys[0], (input_dims, fc1_dims), f1),
        "b1": unif(keys[1], (fc1_dims,), f1),
        "g1": jnp.ones((fc1_dims,), jnp.float32),
        "be1": jnp.zeros((fc1_dims,), jnp.float32),
        # fc2
        "w2": unif(keys[2], (fc1_dims, fc2_dims), f2),
        "b2": unif(keys[3], (fc2_dims,), f2),
        "g2": jnp.ones((fc2_dims,), jnp.float32),
        "be2": jnp.zeros((fc2_dims,), jnp.float32),
        # action_value: in=n_actions, out=fc2_dims
        "wa": unif(keys[4], (n_actions, fc2_dims), f5),
        "ba": unif(keys[5], (fc2_dims,), f5),
        # fc3
        "w3": unif(keys[6], (fc2_dims, fc3_dims), f3),
        "b3": unif(keys[7], (fc3_dims,), f3),
        "g3": jnp.ones((fc3_dims,), jnp.float32),
        "be3": jnp.zeros((fc3_dims,), jnp.float32),
        # q head stored as a lane-dense row [fc3] (same math as a [fc3,1] matmul)
        "wq": unif(keys[8], (fc3_dims,), f4),
        "bq": unif(keys[9], (1,), f4),
    }


def _ln_ref(x, g, b):
    mu = jnp.mean(x, axis=-1, keepdims=True)
    var = jnp.mean((x - mu) ** 2, axis=-1, keepdims=True)
    return (x - mu) / jnp.sqrt(var + LN_EPS) * g + b


def reference_forward_f32(state, action, p):
    """Plain-JAX f32 reference (exact PyTorch semantics)."""
    h1 = jnp.maximum(_ln_ref(state @ p["w1"] + p["b1"], p["g1"], p["be1"]), 0.0)
    h2 = _ln_ref(h1 @ p["w2"] + p["b2"], p["g2"], p["be2"])
    av = action @ p["wa"] + p["ba"]
    sa = jnp.maximum(h2 + av, 0.0)
    h3 = jnp.maximum(_ln_ref(sa @ p["w3"] + p["b3"], p["g3"], p["be3"]), 0.0)
    return jnp.sum(h3 * p["wq"], axis=-1, keepdims=True) + p["bq"]


if __name__ == "__main__":
    # Small shapes consistent with the module:
    #   input_dims * n_agents = 32, n_actions * n_agents = 16,
    #   fc1 = fc2 = fc3 = 128, batch = 8
    BATCH, INPUT_DIMS, N_ACTIONS = 8, 32, 16
    FC1 = FC2 = FC3 = 128

    key = jax.random.PRNGKey(0)
    k_state, k_action, k_params = jax.random.split(key, 3)

    state = jax.random.normal(k_state, (BATCH, INPUT_DIMS), jnp.float32)
    action = jax.random.normal(k_action, (BATCH, N_ACTIONS), jnp.float32)
    params = init_params(k_params, INPUT_DIMS, N_ACTIONS, FC1, FC2, FC3)
    prep = prepare_params(params)

    q = jax.block_until_ready(critic_forward(state, action, prep))
    assert q.shape == (BATCH, 1)

    # Tight check vs. a plain-JAX run of the exact kernel math (same augmented
    # bf16 weights, same f32 LayerNorm/elementwise path).
    q_emu = emulated_forward(state, action, prep)
    assert jnp.allclose(q, q_emu, atol=1e-4, rtol=1e-4), "mismatch vs kernel-path reference"

    # Loose sanity check vs. the pure-f32 PyTorch-semantics reference
    # (differences are bf16 MXU-operand rounding only).
    q_f32 = reference_forward_f32(state, action, params)
    assert jnp.allclose(q, q_f32, atol=5e-3, rtol=5e-2), "mismatch vs f32 reference"

    print("KERNEL_OK")
</pallas_src>

<mosaic_0001>
module attributes {stable_mosaic.version = 11 : i64} {
  func.func @kernel(%arg0: i32, %arg1: memref<8x48xf32, #tpu.memory_space<vmem>>, %arg2: memref<48x257xbf16, #tpu.memory_space<vmem>>, %arg3: memref<128x129xbf16, #tpu.memory_space<vmem>>, %arg4: memref<128x129xbf16, #tpu.memory_space<vmem>>, %arg5: memref<12x128xf32, #tpu.memory_space<vmem>>, %arg6: memref<8x1xf32, #tpu.memory_space<vmem>>) attributes {dimension_semantics = [#tpu.dimension_semantics<parallel>], iteration_bounds = array<i64: 1>, scalar_prefetch = 0 : i64, scratch_operands = 0 : i64, tpu.core_type = #tpu.core_type<tc>, window_params = [{transform_indices = @transform_0, window_bounds = array<i64: 8, 48>}, {pipeline_mode = #tpu.pipeline_mode<synchronous>, transform_indices = @transform_1, window_bounds = array<i64: 48, 257>}, {pipeline_mode = #tpu.pipeline_mode<synchronous>, transform_indices = @transform_2, window_bounds = array<i64: 128, 129>}, {pipeline_mode = #tpu.pipeline_mode<synchronous>, transform_indices = @transform_3, window_bounds = array<i64: 128, 129>}, {pipeline_mode = #tpu.pipeline_mode<synchronous>, transform_indices = @transform_4, window_bounds = array<i64: 12, 128>}, {transform_indices = @transform_5, window_bounds = array<i64: 8, 1>}]} {
    %c0 = arith.constant 0 : index
    %c0_0 = arith.constant 0 : index
    %0 = vector.load %arg1[%c0, %c0_0] : memref<8x48xf32, #tpu.memory_space<vmem>>, vector<8x48xf32>
    %1 = arith.truncf %0 : vector<8x48xf32> to vector<8x48xbf16>
    %c0_1 = arith.constant 0 : index
    %c0_2 = arith.constant 0 : index
    %2 = vector.load %arg2[%c0_1, %c0_2] : memref<48x257xbf16, #tpu.memory_space<vmem>>, vector<48x257xbf16>
    %c0_3 = arith.constant 0 : index
    %c0_4 = arith.constant 0 : index
    %3 = vector.load %arg3[%c0_3, %c0_4] : memref<128x129xbf16, #tpu.memory_space<vmem>>, vector<128x129xbf16>
    %c0_5 = arith.constant 0 : index
    %c0_6 = arith.constant 0 : index
    %4 = vector.load %arg4[%c0_5, %c0_6] : memref<128x129xbf16, #tpu.memory_space<vmem>>, vector<128x129xbf16>
    %c0_7 = arith.constant 0 : index
    %c0_8 = arith.constant 0 : index
    %5 = vector.load %arg5[%c0_7, %c0_8] : memref<12x128xf32, #tpu.memory_space<vmem>>, vector<12x128xf32>
    %6 = vector.extract_strided_slice %5 {offsets = [0, 0], sizes = [1, 128], strides = [1, 1]} : vector<12x128xf32> to vector<1x128xf32>
    %7 = vector.shape_cast %6 : vector<1x128xf32> to vector<128xf32>
    %8 = vector.extract_strided_slice %5 {offsets = [1, 0], sizes = [1, 128], strides = [1, 1]} : vector<12x128xf32> to vector<1x128xf32>
    %9 = vector.shape_cast %8 : vector<1x128xf32> to vector<128xf32>
    %10 = vector.extract_strided_slice %5 {offsets = [2, 0], sizes = [1, 128], strides = [1, 1]} : vector<12x128xf32> to vector<1x128xf32>
    %11 = vector.shape_cast %10 : vector<1x128xf32> to vector<128xf32>
    %12 = vector.extract_strided_slice %5 {offsets = [3, 0], sizes = [1, 128], strides = [1, 1]} : vector<12x128xf32> to vector<1x128xf32>
    %13 = vector.shape_cast %12 : vector<1x128xf32> to vector<128xf32>
    %14 = vector.extract_strided_slice %5 {offsets = [4, 0], sizes = [1, 128], strides = [1, 1]} : vector<12x128xf32> to vector<1x128xf32>
    %15 = vector.shape_cast %14 : vector<1x128xf32> to vector<128xf32>
    %16 = vector.extract_strided_slice %5 {offsets = [5, 0], sizes = [1, 128], strides = [1, 1]} : vector<12x128xf32> to vector<1x128xf32>
    %17 = vector.shape_cast %16 : vector<1x128xf32> to vector<128xf32>
    %18 = vector.extract_strided_slice %5 {offsets = [6, 0], sizes = [1, 128], strides = [1, 1]} : vector<12x128xf32> to vector<1x128xf32>
    %19 = vector.shape_cast %18 : vector<1x128xf32> to vector<128xf32>
    %20 = vector.extract_strided_slice %5 {offsets = [7, 0], sizes = [1, 128], strides = [1, 1]} : vector<12x128xf32> to vector<1x128xf32>
    %21 = vector.shape_cast %20 : vector<1x128xf32> to vector<128xf32>
    %22 = vector.extract_strided_slice %5 {offsets = [8, 0], sizes = [1, 128], strides = [1, 1]} : vector<12x128xf32> to vector<1x128xf32>
    %23 = vector.shape_cast %22 : vector<1x128xf32> to vector<128xf32>
    %24 = vector.extract_strided_slice %5 {offsets = [9, 0], sizes = [1, 128], strides = [1, 1]} : vector<12x128xf32> to vector<1x128xf32>
    %25 = vector.shape_cast %24 : vector<1x128xf32> to vector<128xf32>
    %26 = vector.extract_strided_slice %5 {offsets = [10, 0], sizes = [1, 128], strides = [1, 1]} : vector<12x128xf32> to vector<1x128xf32>
    %27 = vector.shape_cast %26 : vector<1x128xf32> to vector<128xf32>
    %28 = vector.extract_strided_slice %5 {offsets = [11, 0], sizes = [1, 1], strides = [1, 1]} : vector<12x128xf32> to vector<1x1xf32>
    %29 = vector.shape_cast %28 : vector<1x1xf32> to vector<1xf32>
    %30 = vector.extract_strided_slice %5 {offsets = [11, 1], sizes = [1, 1], strides = [1, 1]} : vector<12x128xf32> to vector<1x1xf32>
    %31 = vector.shape_cast %30 : vector<1x1xf32> to vector<1xf32>
    %32 = vector.extract_strided_slice %5 {offsets = [11, 2], sizes = [1, 1], strides = [1, 1]} : vector<12x128xf32> to vector<1x1xf32>
    %33 = vector.shape_cast %32 : vector<1x1xf32> to vector<1xf32>
    %34 = vector.extract_strided_slice %5 {offsets = [11, 3], sizes = [1, 1], strides = [1, 1]} : vector<12x128xf32> to vector<1x1xf32>
    %35 = vector.shape_cast %34 : vector<1x1xf32> to vector<1xf32>
    %cst = arith.constant dense<0.000000e+00> : vector<8x257xf32>
    %36 = tpu.matmul %1, %2, %cst {dimension_numbers = #tpu.dot_dimension_numbers<[1], [0], [0], [1], [0, 0, 1, 1], [], []>} : vector<8x48xbf16>, vector<48x257xbf16>, vector<8x257xf32> -> vector<8x257xf32>
    %37 = vector.extract_strided_slice %36 {offsets = [0, 0], sizes = [8, 128], strides = [1, 1]} : vector<8x257xf32> to vector<8x128xf32>
    %38 = vector.shape_cast %7 : vector<128xf32> to vector<1x128xf32>
    %39 = vector.broadcast %38 : vector<1x128xf32> to vector<8x128xf32>
    %40 = arith.addf %37, %39 : vector<8x128xf32>
    %41 = vector.extract_strided_slice %36 {offsets = [0, 128], sizes = [8, 128], strides = [1, 1]} : vector<8x257xf32> to vector<8x128xf32>
    %42 = vector.shape_cast %19 : vector<128xf32> to vector<1x128xf32>
    %43 = vector.broadcast %42 : vector<1x128xf32> to vector<8x128xf32>
    %44 = arith.addf %41, %43 : vector<8x128xf32>
    %45 = vector.extract_strided_slice %36 {offsets = [0, 256], sizes = [8, 1], strides = [1, 1]} : vector<8x257xf32> to vector<8x1xf32>
    %46 = vector.shape_cast %31 : vector<1xf32> to vector<1x1xf32>
    %47 = vector.broadcast %46 : vector<1x1xf32> to vector<8x1xf32>
    %48 = arith.addf %45, %47 : vector<8x1xf32>
    %49 = vector.broadcast %48 : vector<8x1xf32> to vector<8x128xf32>
    %50 = arith.subf %40, %49 : vector<8x128xf32>
    %51 = arith.mulf %50, %50 : vector<8x128xf32>
    %cst_9 = arith.constant dense<0.000000e+00> : vector<8xf32>
    %52 = vector.multi_reduction <add>, %51, %cst_9 [1] : vector<8x128xf32> to vector<8xf32>
    %53 = vector.shape_cast %52 : vector<8xf32> to vector<8x1xf32>
    %cst_10 = arith.constant 1.280000e+02 : f32
    %54 = vector.broadcast %cst_10 : f32 to vector<8x1xf32>
    %55 = arith.divf %53, %54 : vector<8x1xf32>
    %cst_11 = arith.constant 9.99999974E-6 : f32
    %56 = vector.broadcast %cst_11 : f32 to vector<8x1xf32>
    %57 = arith.addf %55, %56 : vector<8x1xf32>
    %58 = math.rsqrt %57 : vector<8x1xf32>
    %59 = vector.shape_cast %9 : vector<128xf32> to vector<1x128xf32>
    %60 = vector.broadcast %58 : vector<8x1xf32> to vector<8x128xf32>
    %61 = vector.broadcast %59 : vector<1x128xf32> to vector<8x128xf32>
    %62 = arith.mulf %60, %61 : vector<8x128xf32>
    %63 = arith.mulf %50, %62 : vector<8x128xf32>
    %64 = vector.shape_cast %11 : vector<128xf32> to vector<1x128xf32>
    %65 = vector.broadcast %64 : vector<1x128xf32> to vector<8x128xf32>
    %66 = arith.addf %63, %65 : vector<8x128xf32>
    %cst_12 = arith.constant 0.000000e+00 : f32
    %67 = vector.broadcast %cst_12 : f32 to vector<8x128xf32>
    %68 = arith.maximumf %66, %67 : vector<8x128xf32>
    %69 = arith.truncf %68 : vector<8x128xf32> to vector<8x128xbf16>
    %cst_13 = arith.constant dense<0.000000e+00> : vector<8x129xf32>
    %70 = tpu.matmul %69, %3, %cst_13 {dimension_numbers = #tpu.dot_dimension_numbers<[1], [0], [0], [1], [0, 0, 1, 1], [], []>} : vector<8x128xbf16>, vector<128x129xbf16>, vector<8x129xf32> -> vector<8x129xf32>
    %71 = vector.extract_strided_slice %70 {offsets = [0, 0], sizes = [8, 128], strides = [1, 1]} : vector<8x129xf32> to vector<8x128xf32>
    %72 = vector.shape_cast %13 : vector<128xf32> to vector<1x128xf32>
    %73 = vector.broadcast %72 : vector<1x128xf32> to vector<8x128xf32>
    %74 = arith.addf %71, %73 : vector<8x128xf32>
    %75 = vector.extract_strided_slice %70 {offsets = [0, 128], sizes = [8, 1], strides = [1, 1]} : vector<8x129xf32> to vector<8x1xf32>
    %76 = vector.shape_cast %33 : vector<1xf32> to vector<1x1xf32>
    %77 = vector.broadcast %76 : vector<1x1xf32> to vector<8x1xf32>
    %78 = arith.addf %75, %77 : vector<8x1xf32>
    %79 = vector.broadcast %78 : vector<8x1xf32> to vector<8x128xf32>
    %80 = arith.subf %74, %79 : vector<8x128xf32>
    %81 = arith.mulf %80, %80 : vector<8x128xf32>
    %cst_14 = arith.constant dense<0.000000e+00> : vector<8xf32>
    %82 = vector.multi_reduction <add>, %81, %cst_14 [1] : vector<8x128xf32> to vector<8xf32>
    %83 = vector.shape_cast %82 : vector<8xf32> to vector<8x1xf32>
    %cst_15 = arith.constant 1.280000e+02 : f32
    %84 = vector.broadcast %cst_15 : f32 to vector<8x1xf32>
    %85 = arith.divf %83, %84 : vector<8x1xf32>
    %cst_16 = arith.constant 9.99999974E-6 : f32
    %86 = vector.broadcast %cst_16 : f32 to vector<8x1xf32>
    %87 = arith.addf %85, %86 : vector<8x1xf32>
    %88 = math.rsqrt %87 : vector<8x1xf32>
    %89 = vector.shape_cast %15 : vector<128xf32> to vector<1x128xf32>
    %90 = vector.broadcast %88 : vector<8x1xf32> to vector<8x128xf32>
    %91 = vector.broadcast %89 : vector<1x128xf32> to vector<8x128xf32>
    %92 = arith.mulf %90, %91 : vector<8x128xf32>
    %93 = arith.mulf %80, %92 : vector<8x128xf32>
    %94 = vector.shape_cast %17 : vector<128xf32> to vector<1x128xf32>
    %95 = vector.broadcast %94 : vector<1x128xf32> to vector<8x128xf32>
    %96 = arith.addf %93, %95 : vector<8x128xf32>
    %97 = arith.addf %96, %44 : vector<8x128xf32>
    %cst_17 = arith.constant 0.000000e+00 : f32
    %98 = vector.broadcast %cst_17 : f32 to vector<8x128xf32>
    %99 = arith.maximumf %97, %98 : vector<8x128xf32>
    %100 = arith.truncf %99 : vector<8x128xf32> to vector<8x128xbf16>
    %cst_18 = arith.constant dense<0.000000e+00> : vector<8x129xf32>
    %101 = tpu.matmul %100, %4, %cst_18 {dimension_numbers = #tpu.dot_dimension_numbers<[1], [0], [0], [1], [0, 0, 1, 1], [], []>} : vector<8x128xbf16>, vector<128x129xbf16>, vector<8x129xf32> -> vector<8x129xf32>
    %102 = vector.extract_strided_slice %101 {offsets = [0, 0], sizes = [8, 128], strides = [1, 1]} : vector<8x129xf32> to vector<8x128xf32>
    %103 = vector.shape_cast %21 : vector<128xf32> to vector<1x128xf32>
    %104 = vector.broadcast %103 : vector<1x128xf32> to vector<8x128xf32>
    %105 = arith.addf %102, %104 : vector<8x128xf32>
    %106 = vector.extract_strided_slice %101 {offsets = [0, 128], sizes = [8, 1], strides = [1, 1]} : vector<8x129xf32> to vector<8x1xf32>
    %107 = vector.shape_cast %35 : vector<1xf32> to vector<1x1xf32>
    %108 = vector.broadcast %107 : vector<1x1xf32> to vector<8x1xf32>
    %109 = arith.addf %106, %108 : vector<8x1xf32>
    %110 = vector.broadcast %109 : vector<8x1xf32> to vector<8x128xf32>
    %111 = arith.subf %105, %110 : vector<8x128xf32>
    %112 = arith.mulf %111, %111 : vector<8x128xf32>
    %cst_19 = arith.constant dense<0.000000e+00> : vector<8xf32>
    %113 = vector.multi_reduction <add>, %112, %cst_19 [1] : vector<8x128xf32> to vector<8xf32>
    %114 = vector.shape_cast %113 : vector<8xf32> to vector<8x1xf32>
    %cst_20 = arith.constant 1.280000e+02 : f32
    %115 = vector.broadcast %cst_20 : f32 to vector<8x1xf32>
    %116 = arith.divf %114, %115 : vector<8x1xf32>
    %cst_21 = arith.constant 9.99999974E-6 : f32
    %117 = vector.broadcast %cst_21 : f32 to vector<8x1xf32>
    %118 = arith.addf %116, %117 : vector<8x1xf32>
    %119 = math.rsqrt %118 : vector<8x1xf32>
    %120 = vector.shape_cast %23 : vector<128xf32> to vector<1x128xf32>
    %121 = vector.broadcast %119 : vector<8x1xf32> to vector<8x128xf32>
    %122 = vector.broadcast %120 : vector<1x128xf32> to vector<8x128xf32>
    %123 = arith.mulf %121, %122 : vector<8x128xf32>
    %124 = arith.mulf %111, %123 : vector<8x128xf32>
    %125 = vector.shape_cast %25 : vector<128xf32> to vector<1x128xf32>
    %126 = vector.broadcast %125 : vector<1x128xf32> to vector<8x128xf32>
    %127 = arith.addf %124, %126 : vector<8x128xf32>
    %cst_22 = arith.constant 0.000000e+00 : f32
    %128 = vector.broadcast %cst_22 : f32 to vector<8x128xf32>
    %129 = arith.maximumf %127, %128 : vector<8x128xf32>
    %130 = vector.shape_cast %27 : vector<128xf32> to vector<1x128xf32>
    %131 = vector.broadcast %130 : vector<1x128xf32> to vector<8x128xf32>
    %132 = arith.mulf %129, %131 : vector<8x128xf32>
    %cst_23 = arith.constant dense<0.000000e+00> : vector<8xf32>
    %133 = vector.multi_reduction <add>, %132, %cst_23 [1] : vector<8x128xf32> to vector<8xf32>
    %134 = vector.shape_cast %133 : vector<8xf32> to vector<8x1xf32>
    %135 = vector.shape_cast %29 : vector<1xf32> to vector<1x1xf32>
    %136 = vector.broadcast %135 : vector<1x1xf32> to vector<8x1xf32>
    %137 = arith.addf %134, %136 : vector<8x1xf32>
    %c0_24 = arith.constant 0 : index
    %c0_25 = arith.constant 0 : index
    %138 = vector.load %arg6[%c0_24, %c0_25] : memref<8x1xf32, #tpu.memory_space<vmem>>, vector<8x1xf32>
    tpu.vector_store %arg6[%c0_24, %c0_25], %137 {strides = array<i32>} : memref<8x1xf32, #tpu.memory_space<vmem>>, vector<8x1xf32>,
    return
  }
  func.func @transform_0(%arg0: i32) -> (i32, i32) {
    %c0_i32 = arith.constant 0 : i32
    %c0_i32_0 = arith.constant 0 : i32
    return %arg0, %c0_i32 : i32, i32
  }
  func.func @transform_1(%arg0: i32) -> (i32, i32) {
    %c0_i32 = arith.constant 0 : i32
    %c0_i32_0 = arith.constant 0 : i32
    %c0_i32_1 = arith.constant 0 : i32
    return %c0_i32, %c0_i32_0 : i32, i32
  }
  func.func @transform_2(%arg0: i32) -> (i32, i32) {
    %c0_i32 = arith.constant 0 : i32
    %c0_i32_0 = arith.constant 0 : i32
    %c0_i32_1 = arith.constant 0 : i32
    return %c0_i32, %c0_i32_0 : i32, i32
  }
  func.func @transform_3(%arg0: i32) -> (i32, i32) {
    %c0_i32 = arith.constant 0 : i32
    %c0_i32_0 = arith.constant 0 : i32
    %c0_i32_1 = arith.constant 0 : i32
    return %c0_i32, %c0_i32_0 : i32, i32
  }
  func.func @transform_4(%arg0: i32) -> (i32, i32) {
    %c0_i32 = arith.constant 0 : i32
    %c0_i32_0 = arith.constant 0 : i32
    %c0_i32_1 = arith.constant 0 : i32
    return %c0_i32, %c0_i32_0 : i32, i32
  }
  func.func @transform_5(%arg0: i32) -> (i32, i32) {
    %c0_i32 = arith.constant 0 : i32
    %c0_i32_0 = arith.constant 0 : i32
    return %arg0, %c0_i32 : i32, i32
  }
}

</mosaic_0001>

<bundles_post_ra>
// kernel: tpu_custom_call.1
= control target key start
LH: loop header
LB: loop body
LE: loop exit
PB: predicated region body
PF: predicated region fallthrough
CT: control target
= control target key end

     0   :  { %v202_v0 = vlaneseq  ;;  %v702_v1 = vmov 0.0   ;;  %vm703_vm0 = vmmov 0   ;;  %v704_v8 = vmov 0   ;;  %s706_s20 = smov 126   ;;  %s707_s23 = smov 125   ;;  %s924_s1 = inlined_call_operand.vmem [shape: bf16[48,257], index: 1, kind: input, shape index: {}]   ;;  %s925_s4 = inlined_call_operand.vmem [shape: f32[12,128], index: 4, kind: input, shape index: {}]   ;;  %s926_s0 = inlined_call_operand.vmem [shape: f32[8,48], index: 0, kind: input, shape index: {}]   ;;  %s927_s2 = inlined_call_operand.vmem [shape: bf16[128,129], index: 2, kind: input, shape index: {}]   ;;  %s928_s3 = inlined_call_operand.vmem [shape: bf16[128,129], index: 3, kind: input, shape index: {}]   ;;  %s929_s5 = inlined_call_operand.vmem [shape: f32[8,1], index: 5, kind: output, shape index: {}]  }
   0x1   :  { %618 = vmatprep.subr.bf16.mxu1 %v702_v1  ;;  %v636_v2 = vld [vmem:[%s924_s1 + $0x38] ss:$12 sps:$4 sm:$0xff]   ;;  %624 = vmatprep.mubr.msk.bf16.mxu1 %vm703_vm0, %v702_v1  ;;  %v637_v3 = vld [vmem:[%s924_s1 + $0x20] ss:$12 sps:$4 sm:$0xff]   ;;  %v747_v4 = vld [vmem:[%s925_s4 + $0x8] sm:$0xf] }
   0x2   :  { %619 = vmatpush3.bf16.msra.mxu1 %v636_v2  ;;  %v749_v5 = vshrl.u32 %v202_v0, 7  ;;  %v638_v6 = vld [vmem:[%s924_s1 + $0x8] ss:$12 sps:$4 sm:$0xff]   ;;  %153 = vmatprep.mubr.bf16.mxu0 %v704_v8  ;;  %v641_v10 = vld [vmem:[%s924_s1 + $0x30] ss:$12 sps:$4 sm:$0xff]   ;;  %v21_v11 = vld [vmem:[%s926_s0] sm:$0xff] }
   0x3   :  { %620 = vmatprep.subr.bf16.mxu1 %v702_v1  ;;  %v639_v7 = vld [vmem:[%s924_s1 + $0x34] ss:$12 sps:$4 sm:$0xff]   ;;  %634 = vset.pattern.permute.xlu0 %v704_v8  ;;  %v642_v12 = vld [vmem:[%s924_s1 + $0x1c] ss:$12 sps:$4 sm:$0xff]   ;;  %v644_v14 = vld [vmem:[%s924_s1 + $0x18] ss:$12 sps:$4 sm:$0xff]   ;;  %v22_v16 = vpack.c.bf16 %v21_v11, %v21_v11 }
   0x4   :  { %v214_v9 = vsub.s32 3, %v749_v5  ;;  %635 = vset.pattern.permute.xlu1 %v704_v8  ;;  %131 = vmatprep.subr.bf16.mxu0 %v639_v7  ;;  %v645_v15 = vld [vmem:[%s924_s1 + $0x4] ss:$12 sps:$4 sm:$0xff]   ;;  %s705_s0 = smov 127   ;;  %vm117_vm1 = vcmask 392192   ;;  %v204_v30 = vsub.s32 0, %v749_v5 }
   0x5   :  { %132 = vmatpush1.bf16.msra.mxu0 %v641_v10  ;;  %v647_v17 = vld [vmem:[%s924_s1] ss:$12 sps:$4 sm:$0xff]   ;;  %v648_v23 = vld [vmem:[%s927_s2 + $0x70] ss:$8 sps:$4 sm:$0xff]   ;;  %v650_v25 = vld [vmem:[%s927_s2 + $0x74] ss:$8 sps:$4 sm:$0xff]  }
   0x6   :  { %621 = vmatpush3.bf16.msra.mxu1 %v637_v3  ;;  %v770_v13 = vrot.slane %v747_v4, %v214_v9  ;;  %133 = vmatprep.subr.bf16.mxu0 %v642_v12  ;;  %v794_v31 = vld [vmem:[%s925_s4] sm:$0xff]  ;;  %v656_v39 = vld [vmem:[%s927_s2 + $0x54] ss:$8 sps:$4 sm:$0xff]   ;;  %v654_v40 = vld [vmem:[%s927_s2 + $0x50] ss:$8 sps:$4 sm:$0xff]   ;;  %v236_v54 = vsub.s32 1, %v749_v5 }
   0x7   :  { %622 = vmatprep.subr.bf16.mxu1 %v702_v1  ;;  %v205_v32 = vrot.slane %v794_v31, %v204_v30  ;;  %v653_v37 = vld [vmem:[%s927_s2 + $0x64] ss:$8 sps:$4 sm:$0xff]   ;;  %v651_v38 = vld [vmem:[%s927_s2 + $0x60] ss:$8 sps:$4 sm:$0xff]   ;;  %v662_v43 = vld [vmem:[%s927_s2 + $0x34] ss:$8 sps:$4 sm:$0xff]   ;;  %v371_v11 = vrot.slane %v794_v31, %v214_v9 }
   0x8   :  { %217 = vrot.lane.b32.xlu0 %v770_v13, %s705_s0  ;;  %v659_v41 = vld [vmem:[%s927_s2 + $0x44] ss:$8 sps:$4 sm:$0xff]   ;;  %v657_v42 = vld [vmem:[%s927_s2 + $0x40] ss:$8 sps:$4 sm:$0xff]   ;;  %v660_v44 = vld [vmem:[%s927_s2 + $0x30] ss:$8 sps:$4 sm:$0xff]   ;;  %v237_v55 = vrot.slane %v794_v31, %v236_v54 }
   0x9   :  { %134 = vmatpush1.bf16.msra.mxu0 %v644_v14  ;;  %v665_v45 = vld [vmem:[%s927_s2 + $0x24] ss:$8 sps:$4 sm:$0xff]   ;;  %v663_v46 = vld [vmem:[%s927_s2 + $0x20] ss:$8 sps:$4 sm:$0xff]   ;;  %v668_v47 = vld [vmem:[%s927_s2 + $0x14] ss:$8 sps:$4 sm:$0xff]  }
   0xa   :  { %623 = vmatpush3.bf16.msra.mxu1 %v638_v6  ;;  %135 = vmatprep.subr.bf16.mxu0 %v645_v15  ;;  %v666_v48 = vld [vmem:[%s927_s2 + $0x10] ss:$8 sps:$4 sm:$0xff]   ;;  %v671_v49 = vld [vmem:[%s927_s2 + $0x4] ss:$8 sps:$4 sm:$0xff]   ;;  %v669_v50 = vld [vmem:[%s927_s2] ss:$8 sps:$4 sm:$0xff]  }
   0xb   :  { %v242_v56 = vsub.s32 2, %v749_v5  ;;  %v674_v10 = vld [vmem:[%s928_s3 + $0x74] ss:$8 sps:$4 sm:$0xff]   ;;  %vm565_vm2 = vcmask 7168  }
   0xc   :  { %483 = vmatprep.subr.bf16.mxu1 %v674_v10  ;;  %v680_v9 = vld [vmem:[%s928_s3 + $0x54] ss:$8 sps:$4 sm:$0xff]  }
   0xd   :  { %625 = vmatmul.mubr.msk.bf16.vlgmr.msra.gmra.mxu1 %vm117_vm1, %v22_v16  ;;  %136 = vmatpush1.bf16.msra.mxu0 %v647_v17  ;;  %v243_v59 = vrot.slane %v794_v31, %v242_v56  ;;  %v677_v17 = vld [vmem:[%s928_s3 + $0x64] ss:$8 sps:$4 sm:$0xff]   ;;  %v560_v10 = vrot.slane %v747_v4, %v242_v56 }
   0xe   :  { %515 = vmatprep.mubr.bf16.mxu1 %v704_v8  ;;  %327 = vmatprep.subr.bf16.mxu0 %v650_v25  ;;  %v687_v25 = vld [vmem:[%s928_s3 + $0x20] ss:$8 sps:$4 sm:$0xff]  }
  0x10   :  { %580 = vmatmul.mubr.msk.bf16.vlgmr.msra.gmra.mxu0 %vm117_vm1, %v22_v16 }
  0x11   :  { %359 = vmatprep.mubr.bf16.mxu0 %v704_v8  ;;  %328 = vmatpush1.bf16.msra.mxu0 %v648_v23  ;;  %v672_v8 = vld [vmem:[%s928_s3 + $0x70] ss:$8 sps:$4 sm:$0xff]  }
  0x12   :  { %329 = vmatprep.subr.bf16.mxu0 %v653_v37  ;;  %484 = vmatpush1.bf16.msra.mxu1 %v672_v8  ;;  %v684_v23 = vld [vmem:[%s928_s3 + $0x30] ss:$8 sps:$4 sm:$0xff]   ;;  %v209_v37 = vsub.s32 6, %v749_v5 }
  0x13   :  { %485 = vmatprep.subr.bf16.mxu1 %v677_v17 }
  0x15   :  { %330 = vmatpush1.bf16.msra.mxu0 %v651_v38 }
  0x16   :  { %331 = vmatprep.subr.bf16.mxu0 %v656_v39  ;;  %v397_v39 = vsub.s32 5, %v749_v5 }
  0x19   :  { %332 = vmatpush1.bf16.msra.mxu0 %v654_v40 }
  0x1a   :  { %333 = vmatprep.subr.bf16.mxu0 %v659_v41  ;;  %v210_v41 = vrot.slane %v794_v31, %v209_v37 }
  0x1d   :  { %334 = vmatpush1.bf16.msra.mxu0 %v657_v42 }
  0x1e   :  { %335 = vmatprep.subr.bf16.mxu0 %v662_v43  ;;  %v398_v43 = vrot.slane %v794_v31, %v397_v39 }
  0x21   :  { %336 = vmatpush1.bf16.msra.mxu0 %v660_v44 }
  0x22   :  { %337 = vmatprep.subr.bf16.mxu0 %v665_v45 }
  0x25   :  { %338 = vmatpush1.bf16.msra.mxu0 %v663_v46 }
  0x26   :  { %339 = vmatprep.subr.bf16.mxu0 %v668_v47 }
  0x29   :  { %340 = vmatpush1.bf16.msra.mxu0 %v666_v48 }
  0x2a   :  { %341 = vmatprep.subr.bf16.mxu0 %v671_v49 }
  0x2d   :  { %342 = vmatpush1.bf16.msra.mxu0 %v669_v50 }
  0x7a   :  { %v218_v18 = vpop.permute.xlu0 %217 }
  0xcd   :  { %v196_v19 = vpop.f32.mrf.mxu1 }
  0xce   :  { %v220_v20 = vadd.f32 %v218_v18, %v196_v19  ;;  %v675_v18 = vld [vmem:[%s928_s3 + $0x60] ss:$8 sps:$4 sm:$0xff]   ;;  %v678_v19 = vld [vmem:[%s928_s3 + $0x50] ss:$8 sps:$4 sm:$0xff]  }
  0xcf   :  { %v626_v21 = vpop.f32.mrf.mxu1  ;;  %486 = vmatpush1.bf16.msra.mxu1 %v675_v18 }
  0xd0   :  { %223 = vperm.xlu0 %634, %v220_v20   ;;  %v155_v24 = vpop.f32.mrf.mxu0  ;;  %v683_v20 = vld [vmem:[%s928_s3 + $0x44] ss:$8 sps:$4 sm:$0xff]   ;;  %487 = vmatprep.subr.bf16.mxu1 %v680_v9  ;;  %v681_v21 = vld [vmem:[%s928_s3 + $0x40] ss:$8 sps:$4 sm:$0xff]  }
  0xd1   :  { %v199_v22 = vpop.f32.mrf.mxu1  ;;  %v206_v33 = vadd.f32 %v205_v32, %v155_v24  ;;  %v689_v24 = vld [vmem:[%s928_s3 + $0x24] ss:$8 sps:$4 sm:$0xff]   ;;  %v693_v32 = vld [vmem:[%s928_s3] ss:$8 sps:$4 sm:$0xff]  }
  0xd2   :  { %v788_v27 = vpop.f32.mrf.mxu0  ;;  %v686_v22 = vld [vmem:[%s928_s3 + $0x34] ss:$8 sps:$4 sm:$0xff]  }
  0xd3   :  { %v627_v26 = vpop.f32.mrf.mxu1  ;;  %488 = vmatpush1.bf16.msra.mxu1 %v678_v19  ;;  %v211_v45 = vadd.f32 %v210_v41, %v788_v27 }
  0xd4   :  { %v159_v28 = vpop.f32.mrf.mxu0  ;;  %489 = vmatprep.subr.bf16.mxu1 %v683_v20  ;;  %v692_v26 = vld [vmem:[%s928_s3 + $0x14] ss:$8 sps:$4 sm:$0xff]  }
  0xd5   :  { %v690_v28 = vld [vmem:[%s928_s3 + $0x10] ss:$8 sps:$4 sm:$0xff]  }
  0xd6   :  { %v160_v29 = vpop.f32.mrf.mxu0 }
  0xd7   :  { %490 = vmatpush1.bf16.msra.mxu1 %v681_v21  ;;  %v695_v29 = vld [vmem:[%s928_s3 + $0x4] ss:$8 sps:$4 sm:$0xff]  }
  0xd8   :  { %491 = vmatprep.subr.bf16.mxu1 %v686_v22 }
  0xdb   :  { %492 = vmatpush1.bf16.msra.mxu1 %v684_v23 }
  0xdc   :  { %493 = vmatprep.subr.bf16.mxu1 %v689_v24 }
  0xdf   :  { %494 = vmatpush1.bf16.msra.mxu1 %v687_v25 }
  0xe0   :  { %495 = vmatprep.subr.bf16.mxu1 %v692_v26 }
  0xe3   :  { %496 = vmatpush1.bf16.msra.mxu1 %v690_v28 }
  0xe4   :  { %497 = vmatprep.subr.bf16.mxu1 %v695_v29 }
  0xe7   :  { %498 = vmatpush1.bf16.msra.mxu1 %v693_v32 }
 0x14b   :  { %v224_v34 = vpop.permute.xlu0 %223 }
 0x14c   :  { %v226_v35 = vsub.f32 %v206_v33, %v224_v34 }
 0x14e   :  { %v227_v36 = vmul.f32 %v226_v35, %v226_v35 }
 0x150   :  { %228 = vadd.xlane.f32.xlu1 %v227_v36  ;;  %v391_v36 = vsub.s32 4, %v749_v5 }
 0x152   :  { %v392_v38 = vrot.slane %v794_v31, %v391_v36 }
 0x161   :  { %373 = vrot.lane.b32.xlu1 %v770_v13, %s706_s20 }
 0x165   :  { %529 = vrot.lane.b32.xlu1 %v770_v13, %s707_s23 }
 0x1d9   :  { %v229_v51 = vpop.xlane.xlu1 %228 }
 0x1da   :  { %v231_v52 = vmul.f32 0.0078125, %v229_v51 }
 0x1dc   :  { %v232_v53 = vadd.f32 1e-05, %v231_v52 }
 0x1dd   :  { %v374_v1 = vpop.permute.xlu1 %373 }
 0x1de   :  { %696 = vrsqrt.f32 %v232_v53 }
 0x1e1   :  { %v530_v51 = vpop.permute.xlu1 %529 }
 0x1eb   :  { %v697_v57 = vpop.eup %696 }
 0x1ec   :  { %v238_v58 = vmul.f32 %v697_v57, %v237_v55 }
 0x1ee   :  { %v239_v60 = vmul.f32 %v238_v58, %v226_v35  ;;  %v526_v58 = vsub.s32 7, %v749_v5 }
 0x1f0   :  { %v244_v61 = vadd.f32 %v243_v59, %v239_v60  ;;  %v527_v59 = vrot.slane %v794_v31, %v526_v58 }
 0x1f2   :  { %v245_v62 = vmax.f32 %v244_v61, 0.0 }
 0x1f4   :  { %v246_v63 = vpack.c.bf16 %v245_v62, %v245_v62 }
 0x1f6   :  { %360 = vmatmul.mubr.bf16.vlgmr.msra.gmra.mxu0 %v246_v63 }
 0x2b6   :  { %v361_v0 = vpop.f32.mrf.mxu0 }
 0x2b7   :  { %v372_v12 = vadd.f32 %v371_v11, %v361_v0 }
 0x2b8   :  { %v363_v2 = vpop.f32.mrf.mxu0 }
 0x2b9   :  { %v376_v3 = vadd.f32 %v374_v1, %v363_v2  ;;  %v548_v2 = vrot.slane %v747_v4, %v204_v30 }
 0x2ba   :  { %v365_v6 = vpop.f32.mrf.mxu0 }
 0x2bb   :  { %379 = vperm.xlu0 %634, %v376_v3  }
 0x2bc   :  { %v366_v7 = vpop.f32.mrf.mxu0 }
 0x2bd   :  { %v554_v7 = vrot.slane %v747_v4, %v236_v54 }
 0x336   :  { %v380_v14 = vpop.permute.xlu0 %379 }
 0x337   :  { %v382_v15 = vsub.f32 %v372_v12, %v380_v14 }
 0x339   :  { %v383_v16 = vmul.f32 %v382_v15, %v382_v15 }
 0x33b   :  { %384 = vadd.xlane.f32.xlu0 %v383_v16 }
 0x3c4   :  { %v385_v33 = vpop.xlane.xlu0 %384 }
 0x3c5   :  { %v386_v34 = vmul.f32 0.0078125, %v385_v33 }
 0x3c7   :  { %v387_v35 = vadd.f32 1e-05, %v386_v34 }
 0x3c9   :  { %698 = vrsqrt.f32 %v387_v35 }
 0x3d6   :  { %v699_v40 = vpop.eup %698 }
 0x3d7   :  { %v393_v42 = vmul.f32 %v699_v40, %v392_v38 }
 0x3d9   :  { %v394_v44 = vmul.f32 %v393_v42, %v382_v15 }
 0x3db   :  { %v399_v46 = vadd.f32 %v398_v43, %v394_v44 }
 0x3dd   :  { %v400_v47 = vadd.f32 %v399_v46, %v211_v45 }
 0x3df   :  { %v401_v48 = vmax.f32 %v400_v47, 0.0 }
 0x3e1   :  { %v402_v49 = vpack.c.bf16 %v401_v48, %v401_v48 }
 0x3e3   :  { %516 = vmatmul.mubr.bf16.vlgmr.msra.gmra.mxu1 %v402_v49 }
 0x4a3   :  { %v517_v50 = vpop.f32.mrf.mxu1 }
 0x4a4   :  { %v528_v60 = vadd.f32 %v527_v59, %v517_v50 }
 0x4a5   :  { %v519_v52 = vpop.f32.mrf.mxu1 }
 0x4a6   :  { %v532_v53 = vadd.f32 %v530_v51, %v519_v52 }
 0x4a7   :  { %v521_v55 = vpop.f32.mrf.mxu1 }
 0x4a8   :  { %535 = vperm.xlu1 %635, %v532_v53  }
 0x4a9   :  { %v522_v57 = vpop.f32.mrf.mxu1 }
 0x523   :  { %v536_v61 = vpop.permute.xlu1 %535 }
 0x524   :  { %v538_v62 = vsub.f32 %v528_v60, %v536_v61 }
 0x526   :  { %v539_v27 = vmul.f32 %v538_v62, %v538_v62 }
 0x528   :  { %540 = vadd.xlane.f32.xlu1 %v539_v27 }
 0x5b1   :  { %v541_v63 = vpop.xlane.xlu1 %540 }
 0x5b2   :  { %v542_v0 = vmul.f32 0.0078125, %v541_v63 }
 0x5b4   :  { %v543_v1 = vadd.f32 1e-05, %v542_v0 }
 0x5b6   :  { %700 = vrsqrt.f32 %v543_v1 }
 0x5c3   :  { %v701_v3 = vpop.eup %700 }
 0x5c4   :  { %v549_v6 = vmul.f32 %v701_v3, %v548_v2 }
 0x5c6   :  { %v550_v31 = vmul.f32 %v549_v6, %v538_v62 }
 0x5c8   :  { %v555_v8 = vadd.f32 %v554_v7, %v550_v31 }
 0x5ca   :  { %v556_v11 = vmax.f32 %v555_v8, 0.0 }
 0x5cc   :  { %v561_v12 = vmul.f32 %v560_v10, %v556_v11 }
 0x5ce   :  { %562 = vadd.xlane.f32.xlu0 %v561_v12 }
 0x657   :  { %v563_v14 = vpop.xlane.xlu0 %562 }
 0x658   :  { %v564_v15 = vadd.f32 %v563_v14, %v770_v13 }
 0x65a   :  { %566 = vst.msk [vmem:[%s929_s5] sm:$0xff] %vm565_vm2, %v564_v15 }

</bundles_post_ra>
